<compile_context>
chip_gen: v6e
topology: v6e:2x2x1
jax: 0.10.0
libtpu: 0.0.40
codegen_flags: <defaults>
</compile_context>

<pallas_src>
import numpy as np
import jax
import jax.numpy as jnp
from jax.experimental import pallas as pl
from jax.experimental.pallas import tpu as pltpu


def _round_up(x, m):
    return ((x + m - 1) // m) * m


def _lstm_loss_kernel(h_ref, xT_ref, xtgt_ref, mask_ref, w2_ref, out_ref,
                      m_acc, l_acc):
    """Online-LSE over the N (candidate) axis.

    Per (r, k) grid step:
        s = H_tile @ xT_tile                [tr, tn]  (bf16 in, f32 MXU acc)
        streaming max / masked exp-sum update of (m_acc, l_acc)
    At k == last:
        lse   = m_acc + log(l_acc)
        s_tgt = sum(h * x_tgt, axis=1)                (F-wide, N-independent)
        out   = w2 * (s_tgt - lse)          [tr, 2]   (fwd/bwd fused)
    """
    k = pl.program_id(1)
    nk = pl.num_programs(1)

    @pl.when(k == 0)
    def _():
        m_acc[...] = jnp.full_like(m_acc, -jnp.inf)
        l_acc[...] = jnp.zeros_like(l_acc)

    # One MXU call per tile; bf16 operands, f32 accumulation.
    s = jnp.dot(h_ref[...], xT_ref[...], preferred_element_type=jnp.float32)

    # Pad columns produce 0-logits -> harmless for the running max (the real
    # softmax already contains 0-logit boundary rows), but they MUST be masked
    # out of the exp-sum below.
    m_tile = jnp.max(s, axis=1, keepdims=True)
    m_new = jnp.maximum(m_acc[...], m_tile)
    alpha = jnp.exp(m_acc[...] - m_new)          # exp(-inf)=0 at k==0
    p = jnp.exp(s - m_new) * mask_ref[...]       # [tr,tn] * [1,tn] broadcast
    l_acc[...] = alpha * l_acc[...] + jnp.sum(p, axis=1, keepdims=True)
    m_acc[...] = m_new

    @pl.when(k == nk - 1)
    def _():
        lse = m_acc[...] + jnp.log(l_acc[...])
        s_tgt = jnp.sum(h_ref[...].astype(jnp.float32) * xtgt_ref[...],
                        axis=1, keepdims=True)
        out_ref[...] = w2_ref[...] * (s_tgt - lse)


def lstm_loss_pallas(hidden, features, seq_lens, *, tr_max=256, tn_max=2048):
    """hidden: [B, T, H] (H = 2*F, first half = forward dir), features: [B, T, F]
       padded truth features, seq_lens: python list of ints (static).
       Returns (forward_loss, backward_loss), each shape (1,) f32."""
    B, T, H = hidden.shape
    F = H // 2
    assert features.shape[0] == B and features.shape[2] == F
    seq_lens = [int(l) for l in seq_lens]
    N = sum(seq_lens) + 2 * B
    R_valid = 2 * sum(seq_lens)
    f32 = jnp.float32

    if R_valid == 0:
        # Reference would take the mean of an empty diagonal (NaN); return 0s.
        return jnp.zeros((1,), f32), jnp.zeros((1,), f32)

    # --- tiling: conservative sizes fit v7x's 64 MiB VMEM; raise on v6e. ---
    tr = min(tr_max, _round_up(R_valid, 16))          # 16-row granule (bf16 sublanes)
    R_pad = _round_up(R_valid, tr)
    N_pad128 = _round_up(N, 128)                       # lane-align the softmax axis
    tn = min(tn_max, N_pad128)
    N_pad = _round_up(N_pad128, tn)                    # last tile always has >=1 valid col

    # --- xT built directly as [F, N_pad] (no full [N,F] transpose pass) ---
    xT = jnp.zeros((F, N_pad), dtype=f32)
    starts = []
    s = 0
    for i, L in enumerate(seq_lens):
        starts.append(s)
        if L > 0:
            blk = jnp.transpose(features[i, :L].astype(f32))       # [F, L]
            xT = jax.lax.dynamic_update_slice(xT, blk, (0, s + 1))
        s += L + 2

    # --- compact rows: fwd rows then bwd rows per sequence, valid steps only ---
    h_rows, xtgt_rows = [], []
    zrow = jnp.zeros((1, F), dtype=f32)
    for i, L in enumerate(seq_lens):
        if L == 0:
            continue
        feat = features[i, :L].astype(f32)                          # [L, F]
        h_rows.append(hidden[i, :L, :F])                            # forward hidden
        h_rows.append(hidden[i, :L, F:])                            # backward hidden
        # forward target col = start+2+t -> features[i, t+1]; last row hits a zero col
        xtgt_rows.append(jnp.concatenate([feat[1:], zrow], axis=0))
        # backward target col = start+t  -> features[i, t-1]; first row hits a zero col
        xtgt_rows.append(jnp.concatenate([zrow, feat[:-1]], axis=0))
    h_valid = jnp.concatenate(h_rows, axis=0).astype(f32)            # [R_valid, F]
    xtgt_valid = jnp.concatenate(xtgt_rows, axis=0)                  # [R_valid, F]

    pad_r = R_pad - R_valid
    h_stacked = jnp.pad(h_valid, ((0, pad_r), (0, 0)))
    x_tgt = jnp.pad(xtgt_valid, ((0, pad_r), (0, 0)))

    # bf16 MXU operands; everything post-matmul stays f32 (loosens bit-match to
    # the f32 reference slightly, well inside the test tolerance).
    h_bf = h_stacked.astype(jnp.bfloat16)
    xT_bf = xT.astype(jnp.bfloat16)

    # --- fused per-row weights (1/(len*B) in the owning direction, else 0) ---
    w2 = np.zeros((R_pad, 2), dtype=np.float32)
    row = 0
    for L in seq_lens:
        if L == 0:
            continue
        inv = 1.0 / (L * B)
        w2[row:row + L, 0] = inv                      # forward rows
        row += L
        w2[row:row + L, 1] = inv                      # backward rows
        row += L
    w2 = jnp.asarray(w2)

    # --- lane-valid mask for padded N columns (pad cols MUST leave the LSE) ---
    mask = np.zeros((1, N_pad), dtype=np.float32)
    mask[0, :N] = 1.0
    mask = jnp.asarray(mask)

    grid = (R_pad // tr, N_pad // tn)
    out = pl.pallas_call(
        _lstm_loss_kernel,
        out_shape=jax.ShapeDtypeStruct((R_pad, 2), jnp.float32),
        grid_spec=pltpu.PrefetchScalarGridSpec(
            num_scalar_prefetch=0,
            grid=grid,
            in_specs=[
                pl.BlockSpec((tr, F), lambda r, k: (r, 0)),   # h (resident over k)
                pl.BlockSpec((F, tn), lambda r, k: (0, k)),   # xT column tiles (pipelined)
                pl.BlockSpec((tr, F), lambda r, k: (r, 0)),   # target feature rows
                pl.BlockSpec((1, tn), lambda r, k: (0, k)),   # pad-column mask
                pl.BlockSpec((tr, 2), lambda r, k: (r, 0)),   # fused fwd/bwd weights
            ],
            out_specs=pl.BlockSpec((tr, 2), lambda r, k: (r, 0)),
            scratch_shapes=[pltpu.VMEM((tr, 1), jnp.float32),   # running max
                            pltpu.VMEM((tr, 1), jnp.float32)],  # running exp-sum
        ),
        compiler_params=pltpu.CompilerParams(
            dimension_semantics=("parallel", "arbitrary"),
            vmem_limit_bytes=32 * 1024 * 1024),
    )(h_bf, xT_bf, x_tgt, mask, w2)

    losses = -jnp.sum(out, axis=0)                    # [2] = (forward, backward)
    return losses[0:1], losses[1:2]


def lstm_loss_ref(hidden, features, seq_lens):
    """Pure-JAX reference mirroring the PyTorch loop (f32, HIGHEST precision)."""
    B, T, H = hidden.shape
    F = H // 2
    N = sum(seq_lens) + 2 * B
    x = jnp.zeros((N, F), jnp.float32)
    starts = []
    s = 0
    for i, L in enumerate(seq_lens):
        starts.append(s)
        x = jax.lax.dynamic_update_slice(x, features[i, :L], (s + 1, 0))
        s += L + 2
    fl = jnp.zeros((1,), jnp.float32)
    bl = jnp.zeros((1,), jnp.float32)
    hi = jax.lax.Precision.HIGHEST
    for i, L in enumerate(seq_lens):
        hfi = hidden[i, :L, :F]
        hbi = hidden[i, :L, F:]
        lp_f = jax.nn.log_softmax(jnp.dot(hfi, x.T, precision=hi), axis=1)
        lp_b = jax.nn.log_softmax(jnp.dot(hbi, x.T, precision=hi), axis=1)
        si = starts[i]
        fl = fl - jnp.mean(jnp.diagonal(lp_f[:, si + 2: si + 2 + L]))
        bl = bl - jnp.mean(jnp.diagonal(lp_b[:, si: si + L]))
    return fl / B, bl / B


if __name__ == "__main__":
    key = jax.random.PRNGKey(0)
    B, T_max, F = 4, 8, 16
    H = 2 * F
    seq_lens = [6, 8, 5, 7]

    k1, k2 = jax.random.split(key)
    features = jax.random.normal(k1, (B, T_max, F), dtype=jnp.float32)
    hidden = jax.random.normal(k2, (B, T_max, H), dtype=jnp.float32)

    fwd_loss, bwd_loss = lstm_loss_pallas(hidden, features, seq_lens)
    jax.block_until_ready((fwd_loss, bwd_loss))

    fwd_ref, bwd_ref = lstm_loss_ref(hidden, features, seq_lens)
    np.testing.assert_allclose(np.asarray(fwd_loss), np.asarray(fwd_ref),
                               rtol=2e-2, atol=2e-2)
    np.testing.assert_allclose(np.asarray(bwd_loss), np.asarray(bwd_ref),
                               rtol=2e-2, atol=2e-2)

    print("KERNEL_OK")
</pallas_src>

<mosaic_0001>
module attributes {stable_mosaic.version = 11 : i64} {
  func.func @_lstm_loss_kernel(%arg0: i32, %arg1: i32, %arg2: memref<64x16xbf16, #tpu.memory_space<vmem>>, %arg3: memref<16x128xbf16, #tpu.memory_space<vmem>>, %arg4: memref<64x16xf32, #tpu.memory_space<vmem>>, %arg5: memref<1x128xf32, #tpu.memory_space<vmem>>, %arg6: memref<64x2xf32, #tpu.memory_space<vmem>>, %arg7: memref<64x2xf32, #tpu.memory_space<vmem>>, %arg8: memref<64x1xf32, #tpu.memory_space<vmem>>, %arg9: memref<64x1xf32, #tpu.memory_space<vmem>>) attributes {dimension_semantics = [#tpu.dimension_semantics<parallel>, #tpu.dimension_semantics<arbitrary>], iteration_bounds = array<i64: 1, 1>, scalar_prefetch = 0 : i64, scratch_operands = 2 : i64, tpu.core_type = #tpu.core_type<tc>, window_params = [{transform_indices = @transform_0, window_bounds = array<i64: 64, 16>}, {transform_indices = @transform_1, window_bounds = array<i64: 16, 128>}, {transform_indices = @transform_2, window_bounds = array<i64: 64, 16>}, {transform_indices = @transform_3, window_bounds = array<i64: 1, 128>}, {transform_indices = @transform_4, window_bounds = array<i64: 64, 2>}, {transform_indices = @transform_5, window_bounds = array<i64: 64, 2>}]} {
    %c0_i32 = arith.constant 0 : i32
    %0 = arith.cmpi eq, %arg1, %c0_i32 : i32
    %1 = arith.extui %0 : i1 to i32
    %c0_i32_0 = arith.constant 0 : i32
    %2 = arith.cmpi ne, %1, %c0_i32_0 : i32
    scf.if %2 {
      %cst_20 = arith.constant 0xFF800000 : f32
      %29 = vector.broadcast %cst_20 : f32 to vector<64x1xf32>
      %c0_21 = arith.constant 0 : index
      %c0_22 = arith.constant 0 : index
      %30 = vector.load %arg8[%c0_21, %c0_22] : memref<64x1xf32, #tpu.memory_space<vmem>>, vector<64x1xf32>
      tpu.vector_store %arg8[%c0_21, %c0_22], %29 {strides = array<i32>} : memref<64x1xf32, #tpu.memory_space<vmem>>, vector<64x1xf32>,
      %cst_23 = arith.constant 0.000000e+00 : f32
      %31 = vector.broadcast %cst_23 : f32 to vector<64x1xf32>
      %c0_24 = arith.constant 0 : index
      %c0_25 = arith.constant 0 : index
      %32 = vector.load %arg9[%c0_24, %c0_25] : memref<64x1xf32, #tpu.memory_space<vmem>>, vector<64x1xf32>
      tpu.vector_store %arg9[%c0_24, %c0_25], %31 {strides = array<i32>} : memref<64x1xf32, #tpu.memory_space<vmem>>, vector<64x1xf32>,
    } else {
    }
    %c0 = arith.constant 0 : index
    %c0_1 = arith.constant 0 : index
    %3 = vector.load %arg2[%c0, %c0_1] : memref<64x16xbf16, #tpu.memory_space<vmem>>, vector<64x16xbf16>
    %c0_2 = arith.constant 0 : index
    %c0_3 = arith.constant 0 : index
    %4 = vector.load %arg3[%c0_2, %c0_3] : memref<16x128xbf16, #tpu.memory_space<vmem>>, vector<16x128xbf16>
    %cst = arith.constant dense<0.000000e+00> : vector<64x128xf32>
    %5 = tpu.matmul %3, %4, %cst {dimension_numbers = #tpu.dot_dimension_numbers<[1], [0], [0], [1], [0, 0, 1, 1], [], []>} : vector<64x16xbf16>, vector<16x128xbf16>, vector<64x128xf32> -> vector<64x128xf32>
    %cst_4 = arith.constant dense<0xFF800000> : vector<64xf32>
    %6 = vector.multi_reduction <maximumf>, %5, %cst_4 [1] : vector<64x128xf32> to vector<64xf32>
    %7 = vector.shape_cast %6 : vector<64xf32> to vector<64x1xf32>
    %c0_5 = arith.constant 0 : index
    %c0_6 = arith.constant 0 : index
    %8 = vector.load %arg8[%c0_5, %c0_6] : memref<64x1xf32, #tpu.memory_space<vmem>>, vector<64x1xf32>
    %9 = arith.maximumf %8, %7 : vector<64x1xf32>
    %c0_7 = arith.constant 0 : index
    %c0_8 = arith.constant 0 : index
    %10 = vector.load %arg8[%c0_7, %c0_8] : memref<64x1xf32, #tpu.memory_space<vmem>>, vector<64x1xf32>
    %11 = arith.subf %10, %9 : vector<64x1xf32>
    %12 = math.exp %11 : vector<64x1xf32>
    %13 = vector.broadcast %9 : vector<64x1xf32> to vector<64x128xf32>
    %14 = arith.subf %5, %13 : vector<64x128xf32>
    %15 = math.exp %14 : vector<64x128xf32>
    %c0_9 = arith.constant 0 : index
    %c0_10 = arith.constant 0 : index
    %16 = vector.load %arg5[%c0_9, %c0_10] : memref<1x128xf32, #tpu.memory_space<vmem>>, vector<1x128xf32>
    %17 = vector.broadcast %16 : vector<1x128xf32> to vector<64x128xf32>
    %18 = arith.mulf %15, %17 : vector<64x128xf32>
    %c0_11 = arith.constant 0 : index
    %c0_12 = arith.constant 0 : index
    %19 = vector.load %arg9[%c0_11, %c0_12] : memref<64x1xf32, #tpu.memory_space<vmem>>, vector<64x1xf32>
    %20 = arith.mulf %12, %19 : vector<64x1xf32>
    %cst_13 = arith.constant dense<0.000000e+00> : vector<64xf32>
    %21 = vector.multi_reduction <add>, %18, %cst_13 [1] : vector<64x128xf32> to vector<64xf32>
    %22 = vector.shape_cast %21 : vector<64xf32> to vector<64x1xf32>
    %23 = arith.addf %20, %22 : vector<64x1xf32>
    %c0_14 = arith.constant 0 : index
    %c0_15 = arith.constant 0 : index
    %24 = vector.load %arg9[%c0_14, %c0_15] : memref<64x1xf32, #tpu.memory_space<vmem>>, vector<64x1xf32>
    tpu.vector_store %arg9[%c0_14, %c0_15], %23 {strides = array<i32>} : memref<64x1xf32, #tpu.memory_space<vmem>>, vector<64x1xf32>,
    %c0_16 = arith.constant 0 : index
    %c0_17 = arith.constant 0 : index
    %25 = vector.load %arg8[%c0_16, %c0_17] : memref<64x1xf32, #tpu.memory_space<vmem>>, vector<64x1xf32>
    tpu.vector_store %arg8[%c0_16, %c0_17], %9 {strides = array<i32>} : memref<64x1xf32, #tpu.memory_space<vmem>>, vector<64x1xf32>,
    %c0_i32_18 = arith.constant 0 : i32
    %26 = arith.cmpi eq, %arg1, %c0_i32_18 : i32
    %27 = arith.extui %26 : i1 to i32
    %c0_i32_19 = arith.constant 0 : i32
    %28 = arith.cmpi ne, %27, %c0_i32_19 : i32
    scf.if %28 {
      %c0_20 = arith.constant 0 : index
      %c0_21 = arith.constant 0 : index
      %29 = vector.load %arg8[%c0_20, %c0_21] : memref<64x1xf32, #tpu.memory_space<vmem>>, vector<64x1xf32>
      %c0_22 = arith.constant 0 : index
      %c0_23 = arith.constant 0 : index
      %30 = vector.load %arg9[%c0_22, %c0_23] : memref<64x1xf32, #tpu.memory_space<vmem>>, vector<64x1xf32>
      %31 = math.log %30 : vector<64x1xf32>
      %32 = arith.addf %29, %31 : vector<64x1xf32>
      %c0_24 = arith.constant 0 : index
      %c0_25 = arith.constant 0 : index
      %33 = vector.load %arg2[%c0_24, %c0_25] : memref<64x16xbf16, #tpu.memory_space<vmem>>, vector<64x16xbf16>
      %34 = arith.extf %33 : vector<64x16xbf16> to vector<64x16xf32>
      %c0_26 = arith.constant 0 : index
      %c0_27 = arith.constant 0 : index
      %35 = vector.load %arg4[%c0_26, %c0_27] : memref<64x16xf32, #tpu.memory_space<vmem>>, vector<64x16xf32>
      %36 = arith.mulf %34, %35 : vector<64x16xf32>
      %cst_28 = arith.constant dense<0.000000e+00> : vector<64xf32>
      %37 = vector.multi_reduction <add>, %36, %cst_28 [1] : vector<64x16xf32> to vector<64xf32>
      %38 = vector.shape_cast %37 : vector<64xf32> to vector<64x1xf32>
      %c0_29 = arith.constant 0 : index
      %c0_30 = arith.constant 0 : index
      %39 = vector.load %arg6[%c0_29, %c0_30] : memref<64x2xf32, #tpu.memory_space<vmem>>, vector<64x2xf32>
      %40 = arith.subf %38, %32 : vector<64x1xf32>
      %41 = vector.broadcast %40 : vector<64x1xf32> to vector<64x2xf32>
      %42 = arith.mulf %39, %41 : vector<64x2xf32>
      %c0_31 = arith.constant 0 : index
      %c0_32 = arith.constant 0 : index
      %43 = vector.load %arg7[%c0_31, %c0_32] : memref<64x2xf32, #tpu.memory_space<vmem>>, vector<64x2xf32>
      tpu.vector_store %arg7[%c0_31, %c0_32], %42 {strides = array<i32>} : memref<64x2xf32, #tpu.memory_space<vmem>>, vector<64x2xf32>,
    } else {
    }
    return
  }
  func.func @transform_0(%arg0: i32, %arg1: i32) -> (i32, i32) {
    %c0_i32 = arith.constant 0 : i32
    %c0_i32_0 = arith.constant 0 : i32
    return %arg0, %c0_i32 : i32, i32
  }
  func.func @transform_1(%arg0: i32, %arg1: i32) -> (i32, i32) {
    %c0_i32 = arith.constant 0 : i32
    %c0_i32_0 = arith.constant 0 : i32
    return %c0_i32, %arg1 : i32, i32
  }
  func.func @transform_2(%arg0: i32, %arg1: i32) -> (i32, i32) {
    %c0_i32 = arith.constant 0 : i32
    %c0_i32_0 = arith.constant 0 : i32
    return %arg0, %c0_i32 : i32, i32
  }
  func.func @transform_3(%arg0: i32, %arg1: i32) -> (i32, i32) {
    %c0_i32 = arith.constant 0 : i32
    %c0_i32_0 = arith.constant 0 : i32
    return %c0_i32, %arg1 : i32, i32
  }
  func.func @transform_4(%arg0: i32, %arg1: i32) -> (i32, i32) {
    %c0_i32 = arith.constant 0 : i32
    %c0_i32_0 = arith.constant 0 : i32
    return %arg0, %c0_i32 : i32, i32
  }
  func.func @transform_5(%arg0: i32, %arg1: i32) -> (i32, i32) {
    %c0_i32 = arith.constant 0 : i32
    %c0_i32_0 = arith.constant 0 : i32
    return %arg0, %c0_i32 : i32, i32
  }
}

</mosaic_0001>

<bundles_post_ra>
// kernel: tpu_custom_call.1
= control target key start
LH: loop header
LB: loop body
LE: loop exit
PB: predicated region body
PF: predicated region fallthrough
CT: control target
= control target key end

     0   :  { %vm78_vm0 = vcmask 130048   ;;  %vm25_vm1 = vcmask 7168   ;;  %v628_v5 = vmov -inf   ;;  %v629_v14 = vmov 0   ;;  %s953_s1 = inlined_call_operand.vmem [shape: bf16[16,128], index: 1, kind: input, shape index: {}]   ;;  %s954_s0 = inlined_call_operand.vmem [shape: bf16[64,16], index: 0, kind: input, shape index: {}]   ;;  %s955_s3 = inlined_call_operand.vmem [shape: f32[1,128], index: 3, kind: input, shape index: {}]   ;;  %s956_s2 = inlined_call_operand.vmem [shape: f32[64,16], index: 2, kind: input, shape index: {}]   ;;  %s957_s4 = inlined_call_operand.vmem [shape: f32[64,2], index: 4, kind: input, shape index: {}]   ;;  %s958_s5 = inlined_call_operand.vmem [shape: f32[64,2], index: 5, kind: output, shape index: {}]  }
   0x1   :  { %v575_v0 = vld [vmem:[%s953_s1] sm:$0xff]   ;;  %v577_v2 = vld [vmem:[%s954_s0 + $0x10] sm:$0xff]   ;;  %v578_v3 = vld [vmem:[%s954_s0 + $0x8] sm:$0xff]   ;;  %28 = vst.msk [vmem:[#allocation2 + $0x10] sm:$0xff] %vm25_vm1, %v628_v5  ;;  %574 = vset.pattern.permute.xlu1 %v629_v14  ;;  %573 = vset.pattern.permute.xlu0 %v629_v14  ;;  %v630_v15 = vmov 0.0   ;;  %vm511_vm2 = vcmask 15360  }
   0x2   :  { %v576_v1 = vld [vmem:[%s954_s0] sm:$0xff]   ;;  %558 = vmatprep.subr.bf16.mxu0 %v575_v0  ;;  %568 = vmatprep.subr.bf16.mxu1 %v575_v0  ;;  %v579_v4 = vld [vmem:[%s954_s0 + $0x18] sm:$0xff]   ;;  %26 = vst.msk [vmem:[#allocation2] sm:$0xff] %vm25_vm1, %v628_v5  ;;  %27 = vst.msk [vmem:[#allocation2 + $0x8] sm:$0xff] %vm25_vm1, %v628_v5 }
   0x3   :  { %559 = vmatpush3.bf16.msra.mxu0 %v575_v0  ;;  %569 = vmatpush3.bf16.msra.mxu1 %v575_v0  ;;  %29 = vst.msk [vmem:[#allocation2 + $0x18] sm:$0xff] %vm25_vm1, %v628_v5  ;;  %30 = vst.msk [vmem:[#allocation2 + $0x20] sm:$0xff] %vm25_vm1, %v628_v5  ;;  %v805_v55 = vld [vmem:[%s955_s3] ss:$0 sm:$0xff] }
   0x4   :  { %560 = vmatprep.mubr.msk.bf16.mxu0 %vm78_vm0, %v576_v1  ;;  %564 = vmatprep.mubr.msk.bf16.mxu1 %vm78_vm0, %v577_v2  ;;  %31 = vst.msk [vmem:[#allocation2 + $0x28] sm:$0xff] %vm25_vm1, %v628_v5  ;;  %32 = vst.msk [vmem:[#allocation2 + $0x30] sm:$0xff] %vm25_vm1, %v628_v5 }
   0x5   :  { %33 = vst.msk [vmem:[#allocation2 + $0x38] sm:$0xff] %vm25_vm1, %v628_v5  ;;  %36 = vst.msk [vmem:[#allocation3 + $0x10] sm:$0xff] %vm25_vm1, %v630_v15 }
   0x6   :  { %561 = vmatmul.mubr.msk.bf16.vlgmr.msra.gmra.mxu0 %vm78_vm0, %v578_v3  ;;  %565 = vmatmul.mubr.msk.bf16.vlgmr.msra.gmra.mxu1 %vm78_vm0, %v579_v4  ;;  %34 = vst.msk [vmem:[#allocation3] sm:$0xff] %vm25_vm1, %v630_v15  ;;  %35 = vst.msk [vmem:[#allocation3 + $0x8] sm:$0xff] %vm25_vm1, %v630_v15 }
   0x7   :  { %37 = vst.msk [vmem:[#allocation3 + $0x18] sm:$0xff] %vm25_vm1, %v630_v15  ;;  %38 = vst.msk [vmem:[#allocation3 + $0x20] sm:$0xff] %vm25_vm1, %v630_v15 }
   0x8   :  { %39 = vst.msk [vmem:[#allocation3 + $0x28] sm:$0xff] %vm25_vm1, %v630_v15  ;;  %40 = vst.msk [vmem:[#allocation3 + $0x30] sm:$0xff] %vm25_vm1, %v630_v15  ;;  %v720_v16 = vld [vmem:[#allocation2 + $0x10] sm:$0xff] }
   0x9   :  { %41 = vst.msk [vmem:[#allocation3 + $0x38] sm:$0xff] %vm25_vm1, %v630_v15  ;;  %v722_v18 = vld [vmem:[#allocation2] sm:$0xff]  ;;  %v756_v33 = vld [vmem:[#allocation2 + $0x8] sm:$0xff] }
   0xa   :  { %v727_v21 = vld [vmem:[#allocation2 + $0x18] sm:$0xff]  ;;  %v737_v25 = vld [vmem:[#allocation2 + $0x20] sm:$0xff] }
   0xb   :  { %v747_v29 = vld [vmem:[#allocation2 + $0x28] sm:$0xff]  ;;  %v774_v41 = vld [vmem:[#allocation2 + $0x30] sm:$0xff] }
   0xc   :  { %v765_v37 = vld [vmem:[#allocation2 + $0x38] sm:$0xff] }
  0xc6   :  { %v688_v6 = vpop.f32.mrf.mxu0  ;;  %v690_v7 = vpop.f32.mrf.mxu1 }
  0xc7   :  { %160 = vmax.xlane.f32.xlu1 %v688_v6 }
  0xc8   :  { %v693_v8 = vpop.f32.mrf.mxu0  ;;  %v695_v9 = vpop.f32.mrf.mxu1 }
  0xc9   :  { %156 = vmax.xlane.f32.xlu0 %v693_v8 }
  0xca   :  { %v698_v10 = vpop.f32.mrf.mxu0  ;;  %v700_v11 = vpop.f32.mrf.mxu1 }
  0xcb   :  { %162 = vmax.xlane.f32.xlu1 %v698_v10 }
  0xcc   :  { %v704_v12 = vpop.f32.mrf.mxu1  ;;  %v707_v13 = vpop.f32.mrf.mxu0 }
  0xcd   :  { %164 = vmax.xlane.f32.xlu0 %v695_v9 }
  0xcf   :  { %166 = vmax.xlane.f32.xlu1 %v704_v12 }
  0xd1   :  { %158 = vmax.xlane.f32.xlu0 %v707_v13 }
  0xd3   :  { %170 = vmax.xlane.f32.xlu1 %v700_v11 }
  0xd5   :  { %168 = vmax.xlane.f32.xlu0 %v690_v7 }
 0x150   :  { %v161_v17 = vpop.xlane.xlu1 %160 }
 0x151   :  { %v725_v19 = vmax.f32 %v720_v16, %v161_v17 }
 0x152   :  { %v157_v20 = vpop.xlane.xlu0 %156 }
 0x153   :  { %v190_v22 = vsub.f32 %v720_v16, %v725_v19  ;;  %342 = vst.msk [vmem:[#allocation2 + $0x10] sm:$0xff] %vm25_vm1, %v725_v19  ;;  %v734_v23 = vmax.f32 %v722_v18, %v157_v20  ;;  %224 = vperm.xlu1 %574, %v725_v19  }
 0x154   :  { %v163_v24 = vpop.xlane.xlu1 %162 }
 0x155   :  { %v188_v26 = vsub.f32 %v722_v18, %v734_v23  ;;  %340 = vst.msk [vmem:[#allocation2] sm:$0xff] %vm25_vm1, %v734_v23  ;;  %v744_v27 = vmax.f32 %v727_v21, %v163_v24  ;;  %214 = vperm.xlu0 %573, %v734_v23  }
 0x156   :  { %v165_v28 = vpop.xlane.xlu0 %164 }
 0x157   :  { %v191_v30 = vsub.f32 %v727_v21, %v744_v27  ;;  %343 = vst.msk [vmem:[#allocation2 + $0x18] sm:$0xff] %vm25_vm1, %v744_v27  ;;  %v754_v31 = vmax.f32 %v737_v25, %v165_v28  ;;  %v535_v28 = vld [vmem:[%s954_s0] sm:$0xff]  }
 0x158   :  { %v167_v32 = vpop.xlane.xlu1 %166 }
 0x159   :  { %v192_v34 = vsub.f32 %v737_v25, %v754_v31  ;;  %344 = vst.msk [vmem:[#allocation2 + $0x20] sm:$0xff] %vm25_vm1, %v754_v31  ;;  %v763_v35 = vmax.f32 %v747_v29, %v167_v32  ;;  %v536_v32 = vunpack.c.l.bf16 %v535_v28  ;;  %v202_v16 = vmul.f32 1.442695, %v191_v30 }
 0x15a   :  { %v159_v36 = vpop.xlane.xlu0 %158 }
 0x15b   :  { %v193_v38 = vsub.f32 %v747_v29, %v763_v35  ;;  %345 = vst.msk [vmem:[#allocation2 + $0x28] sm:$0xff] %vm25_vm1, %v763_v35  ;;  %v772_v39 = vmax.f32 %v756_v33, %v159_v36 }
 0x15c   :  { %v171_v40 = vpop.xlane.xlu1 %170 }
 0x15d   :  { %v189_v42 = vsub.f32 %v756_v33, %v772_v39  ;;  %341 = vst.msk [vmem:[#allocation2 + $0x8] sm:$0xff] %vm25_vm1, %v772_v39  ;;  %v781_v43 = vmax.f32 %v765_v37, %v171_v40  ;;  %v407_v40 = vld [vmem:[%s956_s2] sm:$0xff] }
 0x15e   :  { %v169_v44 = vpop.xlane.xlu0 %168  ;;  %v295_v33 = vld [vmem:[#allocation3 + $0x20] sm:$0xff] }
 0x15f   :  { %v195_v45 = vsub.f32 %v765_v37, %v781_v43  ;;  %347 = vst.msk [vmem:[#allocation2 + $0x38] sm:$0xff] %vm25_vm1, %v781_v43  ;;  %v788_v46 = vmax.f32 %v774_v41, %v169_v44  ;;  %v198_v25 = vmul.f32 1.442695, %v189_v42  ;;  %v292_v37 = vld [vmem:[#allocation3 + $0x8] sm:$0xff] }
 0x161   :  { %v194_v47 = vsub.f32 %v774_v41, %v788_v46  ;;  %346 = vst.msk [vmem:[#allocation2 + $0x30] sm:$0xff] %vm25_vm1, %v788_v46  ;;  %244 = vperm.xlu1 %574, %v788_v46  }
 0x163   :  { %v208_v21 = vmul.f32 1.442695, %v194_v47 }
 0x165   :  { %234 = vperm.xlu1 %574, %v754_v31  }
 0x169   :  { %229 = vperm.xlu1 %574, %v744_v27   ;;  %v210_v27 = vmul.f32 1.442695, %v195_v45 }
 0x16d   :  { %219 = vperm.xlu1 %574, %v772_v39  }
 0x171   :  { %239 = vperm.xlu1 %574, %v763_v35  }
 0x175   :  { %249 = vperm.xlu1 %574, %v781_v43  }
 0x1ce   :  { %v225_v48 = vpop.permute.xlu1 %224 }
 0x1cf   :  { %v254_v49 = vsub.f32 %v688_v6, %v225_v48 }
 0x1d0   :  { %v215_v50 = vpop.permute.xlu0 %214 }
 0x1d1   :  { %v264_v51 = vmul.f32 1.442695, %v254_v49  ;;  %v252_v52 = vsub.f32 %v693_v8, %v215_v50  ;;  %v415_v50 = vmul.f32 %v536_v32, %v407_v40  ;;  %v196_v40 = vmul.f32 1.442695, %v188_v26 }
 0x1d2   :  { %v206_v26 = vmul.f32 1.442695, %v193_v38  ;;  %v294_v38 = vld [vmem:[#allocation3 + $0x18] sm:$0xff] }
 0x1d3   :  { %580 = vpow2.f32 %v264_v51  ;;  %v260_v53 = vmul.f32 1.442695, %v252_v52  ;;  %v409_v51 = vld [vmem:[%s956_s2 + $0x10] sm:$0xff] }
 0x1d4   :  { %v551_v52 = vld [vmem:[%s954_s0 + $0x10] sm:$0xff]  }
 0x1d5   :  { %582 = vpow2.f32 %v260_v53  ;;  %v537_v53 = vunpack.c.h.bf16 %v535_v28 }
 0x1dc   :  { %v245_v54 = vpop.permute.xlu1 %244 }
 0x1dd   :  { %v258_v1 = vsub.f32 %v690_v7, %v245_v54 }
 0x1df   :  { %v272_v5 = vmul.f32 1.442695, %v258_v1 }
 0x1e0   :  { %v581_v56 = vpop.eup %580  ;;  %v235_v57 = vpop.permute.xlu1 %234 }
 0x1e1   :  { %v256_v58 = vsub.f32 %v695_v9, %v235_v57  ;;  %v285_v59 = vmul.f32 %v581_v56, %v805_v55  ;;  %v408_v57 = vld [vmem:[%s956_s2 + $0x8] sm:$0xff] }
 0x1e2   :  { %v583_v60 = vpop.eup %582 }
 0x1e3   :  { %v268_v61 = vmul.f32 1.442695, %v256_v58  ;;  %311 = vadd.xlane.f32.xlu0 %v285_v59  ;;  %v283_v62 = vmul.f32 %v583_v60, %v805_v55  ;;  %v544_v59 = vunpack.c.l.bf16 %v551_v52 }
 0x1e4   :  { %v230_v63 = vpop.permute.xlu1 %229 }
 0x1e5   :  { %584 = vpow2.f32 %v268_v61  ;;  %v255_v0 = vsub.f32 %v698_v10, %v230_v63  ;;  %307 = vadd.xlane.f32.xlu1 %v283_v62  ;;  %v423_v61 = vsel %vm78_vm0, %v415_v50, 0.0  ;;  %v411_v62 = vld [vmem:[%s956_s2 + $0x20] sm:$0xff]  ;;  %v416_v63 = vmul.f32 %v537_v53, %v408_v57 }
 0x1e7   :  { %v266_v2 = vmul.f32 1.442695, %v255_v0 }
 0x1e8   :  { %v220_v3 = vpop.permute.xlu1 %219 }
 0x1e9   :  { %586 = vpow2.f32 %v266_v2  ;;  %v253_v4 = vsub.f32 %v707_v13, %v220_v3  ;;  %v410_v2 = vld [vmem:[%s956_s2 + $0x18] sm:$0xff] }
 0x1ea   :  { %v552_v3 = vld [vmem:[%s954_s0 + $0x18] sm:$0xff]  }
 0x1eb   :  { %v262_v6 = vmul.f32 1.442695, %v253_v4 }
 0x1ec   :  { %v240_v8 = vpop.permute.xlu1 %239 }
 0x1ed   :  { %588 = vpow2.f32 %v262_v6  ;;  %v257_v9 = vsub.f32 %v704_v12, %v240_v8  ;;  %v426_v6 = vsel %vm78_vm0, %v416_v63, 0.0 }
 0x1ee   :  { %590 = vpow2.f32 %v272_v5  ;;  %v419_v5 = vmul.f32 %v544_v59, %v411_v62  ;;  %v296_v59 = vld [vmem:[#allocation3 + $0x28] sm:$0xff] }
 0x1ef   :  { %v270_v14 = vmul.f32 1.442695, %v257_v9  ;;  %v548_v9 = vunpack.c.l.bf16 %v552_v3 }
 0x1f0   :  { %v250_v15 = vpop.permute.xlu1 %249 }
 0x1f1   :  { %592 = vpow2.f32 %v270_v14  ;;  %v259_v10 = vsub.f32 %v700_v11, %v250_v15  ;;  %v550_v11 = vld [vmem:[%s954_s0 + $0x8] sm:$0xff]   ;;  %v545_v14 = vunpack.c.h.bf16 %v551_v52 }
 0x1f2   :  { %v585_v17 = vpop.eup %584  ;;  %v540_v48 = vunpack.c.l.bf16 %v550_v11  ;;  %v541_v0 = vunpack.c.h.bf16 %v550_v11  ;;  %v412_v15 = vld [vmem:[%s956_s2 + $0x28] sm:$0xff] }
 0x1f3   :  { %v274_v20 = vmul.f32 1.442695, %v259_v10  ;;  %v287_v7 = vmul.f32 %v585_v17, %v805_v55  ;;  %v435_v10 = vsel %vm78_vm0, %v419_v5, 0.0 }
 0x1f4   :  { %v417_v58 = vmul.f32 %v540_v48, %v409_v51  ;;  %v418_v8 = vmul.f32 %v541_v0, %v410_v2  ;;  %v293_v48 = vld [vmem:[#allocation3 + $0x10] sm:$0xff]  ;;  %v291_v51 = vld [vmem:[#allocation3] sm:$0xff] }
 0x1f5   :  { %594 = vpow2.f32 %v274_v20  ;;  %315 = vadd.xlane.f32.xlu0 %v287_v7  ;;  %v420_v7 = vmul.f32 %v545_v14, %v412_v15  ;;  %v351_v14 = vld [vmem:[#allocation2] sm:$0xff] }
 0x1f6   :  { %v587_v24 = vpop.eup %586  ;;  %v429_v4 = vsel %vm78_vm0, %v417_v58, 0.0  ;;  %v432_v17 = vsel %vm78_vm0, %v418_v8, 0.0 }
 0x1f7   :  { %v286_v13 = vmul.f32 %v587_v24, %v805_v55  ;;  %v549_v24 = vunpack.c.h.bf16 %v552_v3 }
 0x1f9   :  { %313 = vadd.xlane.f32.xlu1 %v286_v13  ;;  %v414_v13 = vld [vmem:[%s956_s2 + $0x38] sm:$0xff] }
 0x1fa   :  { %v589_v12 = vpop.eup %588  ;;  %v422_v32 = vmul.f32 %v549_v24, %v414_v13 }
 0x1fb   :  { %v284_v36 = vmul.f32 %v589_v12, %v805_v55  ;;  %v591_v44 = vpop.eup %590  ;;  %v438_v12 = vsel %vm78_vm0, %v420_v7, 0.0 }
 0x1fc   :  { %v289_v54 = vmul.f32 %v591_v44, %v805_v55  ;;  %v444_v11 = vsel %vm78_vm0, %v422_v32, 0.0 }
 0x1fd   :  { %309 = vadd.xlane.f32.xlu0 %v284_v36  ;;  %v200_v36 = vmul.f32 1.442695, %v190_v22 }
 0x1fe   :  { %v593_v49 = vpop.eup %592 }
 0x1ff   :  { %v288_v56 = vmul.f32 %v593_v49, %v805_v55  ;;  %596 = vpow2.f32 %v200_v36  ;;  %v204_v49 = vmul.f32 1.442695, %v192_v34 }
 0x200   :  { %598 = vpow2.f32 %v196_v40 }
 0x201   :  { %319 = vadd.xlane.f32.xlu0 %v289_v54  ;;  %317 = vadd.xlane.f32.xlu1 %v288_v56  ;;  %600 = vpow2.f32 %v204_v49 }
 0x202   :  { %v595_v60 = vpop.eup %594  ;;  %602 = vpow2.f32 %v202_v16 }
 0x203   :  { %v290_v1 = vmul.f32 %v595_v60, %v805_v55  ;;  %v413_v55 = vld [vmem:[%s956_s2 + $0x30] sm:$0xff]  ;;  %604 = vpow2.f32 %v198_v25 }
 0x204   :  { %v421_v20 = vmul.f32 %v548_v9, %v413_v55  ;;  %606 = vpow2.f32 %v206_v26  ;;  %v297_v60 = vld [vmem:[#allocation3 + $0x30] sm:$0xff] }
 0x205   :  { %424 = vadd.xlane.f32.xlu0 %v423_v61  ;;  %321 = vadd.xlane.f32.xlu1 %v290_v1  ;;  %608 = vpow2.f32 %v208_v21 }
 0x206   :  { %v441_v28 = vsel %vm78_vm0, %v421_v20, 0.0 }
 0x209   :  { %430 = vadd.xlane.f32.xlu0 %v429_v4  ;;  %427 = vadd.xlane.f32.xlu1 %v426_v6  ;;  %v298_v6 = vld [vmem:[#allocation3 + $0x38] sm:$0xff] }
 0x20c   :  { %v597_v44 = vpop.eup %596 }
 0x20d   :  { %436 = vadd.xlane.f32.xlu0 %v435_v10  ;;  %433 = vadd.xlane.f32.xlu1 %v432_v17  ;;  %v599_v50 = vpop.eup %598  ;;  %v301_v52 = vmul.f32 %v597_v44, %v293_v48 }
 0x20e   :  { %v299_v18 = vmul.f32 %v599_v50, %v291_v51  ;;  %v601_v31 = vpop.eup %600  ;;  %v355_v51 = vld [vmem:[#allocation2 + $0x20] sm:$0xff] }
 0x20f   :  { %v303_v39 = vmul.f32 %v601_v31, %v295_v33  ;;  %v603_v29 = vpop.eup %602  ;;  %v352_v31 = vld [vmem:[#allocation2 + $0x8] sm:$0xff] }
 0x210   :  { %v302_v42 = vmul.f32 %v603_v29, %v294_v38  ;;  %v605_v46 = vpop.eup %604 }
 0x211   :  { %442 = vadd.xlane.f32.xlu0 %v441_v28  ;;  %439 = vadd.xlane.f32.xlu1 %v438_v12  ;;  %v607_v45 = vpop.eup %606  ;;  %v300_v56 = vmul.f32 %v605_v46, %v292_v37  ;;  %v353_v28 = vld [vmem:[#allocation2 + $0x10] sm:$0xff] }
 0x212   :  { %v609_v54 = vpop.eup %608  ;;  %v304_v0 = vmul.f32 %v607_v45, %v296_v59 }
 0x213   :  { %v305_v1 = vmul.f32 %v609_v54, %v297_v60 }
 0x215   :  { %445 = vadd.xlane.f32.xlu1 %v444_v11 }
 0x26c   :  { %v312_v53 = vpop.xlane.xlu0 %311 }
 0x26d   :  { %v325_v19 = vadd.f32 %v312_v53, %v301_v52 }
 0x26e   :  { %v308_v22 = vpop.xlane.xlu1 %307 }
 0x26f   :  { %334 = vst.msk [vmem:[#allocation3 + $0x10] sm:$0xff] %vm25_vm1, %v325_v19  ;;  %v323_v23 = vadd.f32 %v308_v22, %v299_v18 }
 0x271   :  { %332 = vst.msk [vmem:[#allocation3] sm:$0xff] %vm25_vm1, %v323_v23  ;;  %v354_v23 = vld [vmem:[#allocation2 + $0x18] sm:$0xff] }
 0x276   :  { %v361_v34 = vld [vmem:[#allocation3 + $0x10] sm:$0xff] }
 0x278   :  { %v359_v30 = vld [vmem:[#allocation3] sm:$0xff] }
 0x279   :  { %610 = vlog2.f32 %v359_v30 }
 0x27a   :  { %612 = vpow2.f32 %v210_v27 }
 0x27b   :  { %614 = vlog2.f32 %v361_v34 }
 0x27e   :  { %v316_v35 = vpop.xlane.xlu0 %315 }
 0x27f   :  { %v327_v41 = vadd.f32 %v316_v35, %v303_v39 }
 0x281   :  { %336 = vst.msk [vmem:[#allocation3 + $0x20] sm:$0xff] %vm25_vm1, %v327_v41  ;;  %v356_v41 = vld [vmem:[#allocation2 + $0x28] sm:$0xff] }
 0x282   :  { %v314_v47 = vpop.xlane.xlu1 %313 }
 0x283   :  { %v326_v43 = vadd.f32 %v314_v47, %v302_v42  ;;  %v357_v47 = vld [vmem:[#allocation2 + $0x30] sm:$0xff] }
 0x285   :  { %335 = vst.msk [vmem:[#allocation3 + $0x18] sm:$0xff] %vm25_vm1, %v326_v43 }
 0x286   :  { %v611_v57 = vpop.eup %610  ;;  %v310_v58 = vpop.xlane.xlu0 %309 }
 0x287   :  { %v324_v61 = vadd.f32 %v310_v58, %v300_v56  ;;  %v613_v63 = vpop.eup %612  ;;  %v368_v2 = vmul.f32 0.6931472, %v611_v57  ;;  %v358_v58 = vld [vmem:[#allocation2 + $0x38] sm:$0xff] }
 0x288   :  { %v363_v62 = vld [vmem:[#allocation3 + $0x20] sm:$0xff]  ;;  %v615_v3 = vpop.eup %614  ;;  %v306_v15 = vmul.f32 %v613_v63, %v298_v6 }
 0x289   :  { %333 = vst.msk [vmem:[#allocation3 + $0x8] sm:$0xff] %vm25_vm1, %v324_v61  ;;  %616 = vlog2.f32 %v363_v62  ;;  %v383_v10 = vadd.f32 %v368_v2, %v351_v14  ;;  %v372_v17 = vmul.f32 0.6931472, %v615_v3  ;;  %v447_v62 = vld [vmem:[%s957_s4] sm:$0xff] }
 0x28a   :  { %v318_v4 = vpop.xlane.xlu1 %317  ;;  %v320_v5 = vpop.xlane.xlu0 %319 }
 0x28b   :  { %v328_v8 = vadd.f32 %v318_v4, %v304_v0  ;;  %v329_v9 = vadd.f32 %v320_v5, %v305_v1  ;;  %v385_v32 = vadd.f32 %v372_v17, %v353_v28  ;;  %v449_v1 = vld [vmem:[%s957_s4 + $0x10] sm:$0xff]  ;;  %v451_v4 = vld [vmem:[%s957_s4 + $0x20] sm:$0xff]  ;;  %v452_v17 = vld [vmem:[%s957_s4 + $0x28] sm:$0xff] }
 0x28c   :  { %v362_v55 = vld [vmem:[#allocation3 + $0x18] sm:$0xff] }
 0x28d   :  { %337 = vst.msk [vmem:[#allocation3 + $0x28] sm:$0xff] %vm25_vm1, %v328_v8  ;;  %338 = vst.msk [vmem:[#allocation3 + $0x30] sm:$0xff] %vm25_vm1, %v329_v9  ;;  %618 = vlog2.f32 %v362_v55  ;;  %v450_v8 = vld [vmem:[%s957_s4 + $0x18] sm:$0xff]  ;;  %v448_v55 = vld [vmem:[%s957_s4 + $0x8] sm:$0xff] }
 0x28e   :  { %v322_v20 = vpop.xlane.xlu1 %321  ;;  %v425_v7 = vpop.xlane.xlu0 %424 }
 0x28f   :  { %v330_v24 = vadd.f32 %v322_v20, %v306_v15  ;;  %v455_v13 = vsub.f32 %v425_v7, %v383_v10  ;;  %v453_v20 = vld [vmem:[%s957_s4 + $0x30] sm:$0xff] }
 0x290   :  { %v360_v12 = vld [vmem:[#allocation3 + $0x8] sm:$0xff] }
 0x291   :  { %339 = vst.msk [vmem:[#allocation3 + $0x38] sm:$0xff] %vm25_vm1, %v330_v24  ;;  %465 = vperm.xlu0 %573, %v455_v13   ;;  %620 = vlog2.f32 %v360_v12  ;;  %v454_v12 = vld [vmem:[%s957_s4 + $0x38] sm:$0xff] }
 0x292   :  { %v431_v11 = vpop.xlane.xlu0 %430  ;;  %v428_v49 = vpop.xlane.xlu1 %427 }
 0x293   :  { %v457_v36 = vsub.f32 %v431_v11, %v385_v32 }
 0x294   :  { %v364_v40 = vld [vmem:[#allocation3 + $0x28] sm:$0xff]  ;;  %v365_v44 = vld [vmem:[#allocation3 + $0x30] sm:$0xff] }
 0x295   :  { %475 = vperm.xlu1 %574, %v457_v36   ;;  %622 = vlog2.f32 %v364_v40 }
 0x296   :  { %v617_v48 = vpop.eup %616  ;;  %624 = vlog2.f32 %v365_v44  ;;  %v437_v52 = vpop.xlane.xlu0 %436 }
 0x297   :  { %v376_v50 = vmul.f32 0.6931472, %v617_v48  ;;  %v434_v25 = vpop.xlane.xlu1 %433 }
 0x298   :  { %v366_v53 = vld [vmem:[#allocation3 + $0x38] sm:$0xff] }
 0x299   :  { %v387_v16 = vadd.f32 %v376_v50, %v355_v51  ;;  %626 = vlog2.f32 %v366_v53 }
 0x29a   :  { %v619_v19 = vpop.eup %618  ;;  %v443_v37 = vpop.xlane.xlu0 %442 }
 0x29b   :  { %v459_v18 = vsub.f32 %v437_v52, %v387_v16  ;;  %v374_v22 = vmul.f32 0.6931472, %v619_v19  ;;  %v440_v39 = vpop.xlane.xlu1 %439 }
 0x29d   :  { %485 = vperm.xlu1 %574, %v459_v18   ;;  %v386_v26 = vadd.f32 %v374_v22, %v354_v23 }
 0x29e   :  { %v621_v21 = vpop.eup %620 }
 0x29f   :  { %v370_v27 = vmul.f32 0.6931472, %v621_v21  ;;  %v458_v30 = vsub.f32 %v434_v25, %v386_v26  ;;  %v446_v59 = vpop.xlane.xlu1 %445 }
 0x2a1   :  { %v384_v33 = vadd.f32 %v370_v27, %v352_v31  ;;  %480 = vperm.xlu0 %573, %v458_v30  }
 0x2a2   :  { %v623_v34 = vpop.eup %622 }
 0x2a3   :  { %v625_v29 = vpop.eup %624  ;;  %v456_v35 = vsub.f32 %v428_v49, %v384_v33  ;;  %v378_v38 = vmul.f32 0.6931472, %v623_v34 }
 0x2a4   :  { %v380_v42 = vmul.f32 0.6931472, %v625_v29 }
 0x2a5   :  { %470 = vperm.xlu1 %574, %v456_v35   ;;  %v388_v46 = vadd.f32 %v378_v38, %v356_v41 }
 0x2a6   :  { %v627_v43 = vpop.eup %626  ;;  %v389_v45 = vadd.f32 %v380_v42, %v357_v47 }
 0x2a7   :  { %v460_v54 = vsub.f32 %v440_v39, %v388_v46  ;;  %v382_v56 = vmul.f32 0.6931472, %v627_v43 }
 0x2a8   :  { %v461_v57 = vsub.f32 %v443_v37, %v389_v45 }
 0x2a9   :  { %490 = vperm.xlu0 %573, %v460_v54   ;;  %v390_v60 = vadd.f32 %v382_v56, %v358_v58 }
 0x2aa   :  { %495 = vperm.xlu1 %574, %v461_v57  }
 0x2ab   :  { %v462_v61 = vsub.f32 %v446_v59, %v390_v60 }
 0x2ad   :  { %500 = vperm.xlu0 %573, %v462_v61  }
 0x30c   :  { %v466_v63 = vpop.permute.xlu0 %465 }
 0x30d   :  { %v503_v0 = vmul.f32 %v466_v63, %v447_v62 }
 0x30f   :  { %512 = vst.msk [vmem:[%s958_s5] sm:$0xff] %vm511_vm2, %v503_v0 }
 0x310   :  { %v476_v2 = vpop.permute.xlu1 %475 }
 0x311   :  { %v505_v3 = vmul.f32 %v476_v2, %v449_v1 }
 0x313   :  { %514 = vst.msk [vmem:[%s958_s5 + $0x10] sm:$0xff] %vm511_vm2, %v505_v3 }
 0x318   :  { %v486_v5 = vpop.permute.xlu1 %485 }
 0x319   :  { %v507_v6 = vmul.f32 %v486_v5, %v451_v4 }
 0x31b   :  { %516 = vst.msk [vmem:[%s958_s5 + $0x20] sm:$0xff] %vm511_vm2, %v507_v6 }
 0x31c   :  { %v481_v9 = vpop.permute.xlu0 %480 }
 0x31d   :  { %v506_v14 = vmul.f32 %v481_v9, %v450_v8 }
 0x31f   :  { %515 = vst.msk [vmem:[%s958_s5 + $0x18] sm:$0xff] %vm511_vm2, %v506_v14 }
 0x320   :  { %v471_v15 = vpop.permute.xlu1 %470 }
 0x321   :  { %v504_v10 = vmul.f32 %v471_v15, %v448_v55 }
 0x323   :  { %513 = vst.msk [vmem:[%s958_s5 + $0x8] sm:$0xff] %vm511_vm2, %v504_v10 }
 0x324   :  { %v491_v7 = vpop.permute.xlu0 %490 }
 0x325   :  { %v496_v24 = vpop.permute.xlu1 %495  ;;  %v508_v13 = vmul.f32 %v491_v7, %v452_v17 }
 0x326   :  { %v509_v28 = vmul.f32 %v496_v24, %v453_v20 }
 0x327   :  { %517 = vst.msk [vmem:[%s958_s5 + $0x28] sm:$0xff] %vm511_vm2, %v508_v13 }
 0x328   :  { %518 = vst.msk [vmem:[%s958_s5 + $0x30] sm:$0xff] %vm511_vm2, %v509_v28  ;;  %v501_v32 = vpop.permute.xlu0 %500 }
 0x329   :  { %v510_v11 = vmul.f32 %v501_v32, %v454_v12 }
 0x32b   :  { %519 = vst.msk [vmem:[%s958_s5 + $0x38] sm:$0xff] %vm511_vm2, %v510_v11 }

</bundles_post_ra>
